<compile_context>
chip_gen: v7x
topology: tpu7x:2x2x1
jax: 0.10.0
libtpu: 0.0.40
codegen_flags: <defaults>
</compile_context>

<pallas_src>
import functools

import jax
import jax.numpy as jnp
from jax.experimental import pallas as pl
from jax.experimental.pallas import tpu as pltpu


def _cnn_kernel(x_ref, w_ref, b_ref, o_ref, *, bb, tp, window):
    # x_ref: (bb*tp, W)  zero-padded rows (conv height padding), flattened 2-D
    # w_ref: (W, window*C) with w_ref[w, k*C + c] == conv_weight[c, 0, k, w]
    # b_ref: (1, C)
    # o_ref: (bb, C)
    C = o_ref.shape[-1]
    K = window
    H_out = tp - K + 1            # tp already includes the 2 zero-pad rows

    # Single batched input projection: every (sample, padded-time) row against
    # all `window` weight slices in one MXU op.
    g = jnp.dot(x_ref[...], w_ref[...],
                preferred_element_type=jnp.float32)          # (bb*tp, K*C)
    bias = b_ref[...]                                        # (1, C)

    # Per-sample epilogue (static, fully unrolled; only cheap VPU/XLU work):
    # shifted sum over window offsets, max over time, bias + ReLU.
    for b in range(bb):
        base = b * tp
        acc = g[base:base + H_out, 0:C]
        for k in range(1, K):
            acc = acc + g[base + k:base + k + H_out, k * C:(k + 1) * C]
        pooled = jnp.max(acc, axis=0, keepdims=True)         # (1, C)
        o_ref[b:b + 1, :] = jnp.maximum(pooled + bias, 0.0)


def cnn_forward(embedding, conv_weight, conv_bias, *, window_size):
    """embedding: (B, T, W) float32 -> (B, C) float32 (matches CNN.forward)."""
    B, T, W = embedding.shape
    C = conv_weight.shape[0]
    K = window_size
    PAD = 1                                  # Conv2d padding=(1, 0)
    Tp = T + 2 * PAD
    assert Tp - K + 1 >= 1, "window_size too large for max_length + padding"

    # Zero-pad the time axis (the conv's height padding) and flatten
    # (B, Tp, W) -> (B*Tp, W): metadata-only in XLA, so the kernel works on
    # plain 2-D tiles and needs no in-kernel relayout/reshape.
    x = jnp.pad(embedding.astype(jnp.float32), ((0, 0), (PAD, PAD), (0, 0)))
    x2d = x.reshape(B * Tp, W)

    # (C, 1, K, W) -> (W, K*C): column k*C + c holds conv_weight[c, 0, k, :].
    w_cat = jnp.transpose(conv_weight[:, 0], (2, 1, 0)).reshape(W, K * C)
    w_cat = w_cat.astype(jnp.float32)
    bias = conv_bias.reshape(1, C).astype(jnp.float32)

    # Samples per grid step.  bb*Tp rows of x (a few KiB) per block; grid axis
    # is parallel so megacore / v7x's two TensorCores can split the batch.
    BB = B if B <= 8 else 8
    grid = (pl.cdiv(B, BB),)

    kernel = functools.partial(_cnn_kernel, bb=BB, tp=Tp, window=K)
    return pl.pallas_call(
        kernel,
        out_shape=jax.ShapeDtypeStruct((B, C), jnp.float32),
        grid_spec=pltpu.PrefetchScalarGridSpec(
            num_scalar_prefetch=0,
            grid=grid,
            in_specs=[
                pl.BlockSpec((BB * Tp, W), lambda i: (i, 0)),
                pl.BlockSpec((W, K * C), lambda i: (0, 0)),
                pl.BlockSpec((1, C), lambda i: (0, 0)),
            ],
            out_specs=pl.BlockSpec((BB, C), lambda i: (i, 0)),
        ),
        compiler_params=pltpu.CompilerParams(
            dimension_semantics=("parallel",)),
    )(x2d, w_cat, bias)


def _reference_forward(embedding, conv_weight, conv_bias, *, window_size):
    """Pure-JAX reference of Conv2d(1,C,(K,W),pad=(1,0)) -> max_t -> ReLU."""
    B, T, W = embedding.shape
    K = window_size
    PAD = 1
    xp = jnp.pad(embedding, ((0, 0), (PAD, PAD), (0, 0)))
    H_out = T + 2 * PAD - K + 1
    rows = []
    for t in range(H_out):
        win = xp[:, t:t + K, :]                                   # (B, K, W)
        rows.append(jnp.einsum("bkw,ckw->bc", win, conv_weight[:, 0])
                    + conv_bias)
    conv = jnp.stack(rows, axis=1)                                # (B, H_out, C)
    return jnp.maximum(jnp.max(conv, axis=1), 0.0)


if __name__ == "__main__":
    # Small config consistent with the module:
    # max_length=16, word_size=24, pos_size=4 -> in_width = 24 + 2*4 = 32;
    # hidden_size=32, window_size=3, batch=2.
    max_length, word_size, pos_size = 16, 24, 4
    hidden_size, window_size = 32, 3
    in_width = word_size + 2 * pos_size
    B = 2

    key = jax.random.PRNGKey(0)
    k_emb, k_w, k_b = jax.random.split(key, 3)
    embedding = jax.random.normal(k_emb, (B, max_length, in_width), jnp.float32)

    # Conv2d(1, hidden, (window, in_width)) parameters, PyTorch-style uniform init.
    fan_in = 1 * window_size * in_width
    bound = 1.0 / jnp.sqrt(jnp.float32(fan_in))
    conv_weight = jax.random.uniform(
        k_w, (hidden_size, 1, window_size, in_width), jnp.float32,
        minval=-bound, maxval=bound)
    conv_bias = jax.random.uniform(
        k_b, (hidden_size,), jnp.float32, minval=-bound, maxval=bound)

    out = cnn_forward(embedding, conv_weight, conv_bias,
                      window_size=window_size)
    jax.block_until_ready(out)

    ref = _reference_forward(embedding, conv_weight, conv_bias,
                             window_size=window_size)
    assert out.shape == (B, hidden_size)
    assert jnp.allclose(out, ref, atol=1e-4, rtol=1e-4), "mismatch vs JAX reference"

    print("KERNEL_OK")
</pallas_src>

<mosaic_0001>
module attributes {stable_mosaic.version = 11 : i64} {
  func.func @_cnn_kernel(%arg0: i32, %arg1: memref<36x32xf32, #tpu.memory_space<vmem>>, %arg2: memref<32x96xf32, #tpu.memory_space<vmem>>, %arg3: memref<1x32xf32, #tpu.memory_space<vmem>>, %arg4: memref<2x32xf32, #tpu.memory_space<vmem>>) attributes {dimension_semantics = [#tpu.dimension_semantics<parallel>], iteration_bounds = array<i64: 1>, scalar_prefetch = 0 : i64, scratch_operands = 0 : i64, tpu.core_type = #tpu.core_type<tc>, window_params = [{transform_indices = @transform_0, window_bounds = array<i64: 36, 32>}, {pipeline_mode = #tpu.pipeline_mode<synchronous>, transform_indices = @transform_1, window_bounds = array<i64: 32, 96>}, {pipeline_mode = #tpu.pipeline_mode<synchronous>, transform_indices = @transform_2, window_bounds = array<i64: 1, 32>}, {transform_indices = @transform_3, window_bounds = array<i64: 2, 32>}]} {
    %c0 = arith.constant 0 : index
    %c0_0 = arith.constant 0 : index
    %0 = vector.load %arg1[%c0, %c0_0] : memref<36x32xf32, #tpu.memory_space<vmem>>, vector<36x32xf32>
    %c0_1 = arith.constant 0 : index
    %c0_2 = arith.constant 0 : index
    %1 = vector.load %arg2[%c0_1, %c0_2] : memref<32x96xf32, #tpu.memory_space<vmem>>, vector<32x96xf32>
    %cst = arith.constant dense<0.000000e+00> : vector<36x96xf32>
    %2 = tpu.matmul %0, %1, %cst {dimension_numbers = #tpu.dot_dimension_numbers<[1], [0], [0], [1], [0, 0, 1, 1], [], []>} : vector<36x32xf32>, vector<32x96xf32>, vector<36x96xf32> -> vector<36x96xf32>
    %c0_3 = arith.constant 0 : index
    %c0_4 = arith.constant 0 : index
    %3 = vector.load %arg3[%c0_3, %c0_4] : memref<1x32xf32, #tpu.memory_space<vmem>>, vector<1x32xf32>
    %4 = vector.extract_strided_slice %2 {offsets = [0, 0], sizes = [16, 32], strides = [1, 1]} : vector<36x96xf32> to vector<16x32xf32>
    %5 = vector.extract_strided_slice %2 {offsets = [1, 32], sizes = [16, 32], strides = [1, 1]} : vector<36x96xf32> to vector<16x32xf32>
    %6 = arith.addf %4, %5 : vector<16x32xf32>
    %7 = vector.extract_strided_slice %2 {offsets = [2, 64], sizes = [16, 32], strides = [1, 1]} : vector<36x96xf32> to vector<16x32xf32>
    %8 = arith.addf %6, %7 : vector<16x32xf32>
    %cst_5 = arith.constant dense<0xFF800000> : vector<32xf32>
    %9 = vector.multi_reduction <maximumf>, %8, %cst_5 [0] : vector<16x32xf32> to vector<32xf32>
    %10 = vector.shape_cast %9 : vector<32xf32> to vector<1x32xf32>
    %11 = arith.addf %10, %3 : vector<1x32xf32>
    %cst_6 = arith.constant 0.000000e+00 : f32
    %12 = vector.broadcast %cst_6 : f32 to vector<1x32xf32>
    %13 = arith.maximumf %11, %12 : vector<1x32xf32>
    %c0_7 = arith.constant 0 : index
    %c0_8 = arith.constant 0 : index
    %14 = vector.load %arg4[%c0_7, %c0_8] : memref<2x32xf32, #tpu.memory_space<vmem>>, vector<1x32xf32>
    tpu.vector_store %arg4[%c0_7, %c0_8], %13 {strides = array<i32>} : memref<2x32xf32, #tpu.memory_space<vmem>>, vector<1x32xf32>,
    %15 = vector.extract_strided_slice %2 {offsets = [18, 0], sizes = [16, 32], strides = [1, 1]} : vector<36x96xf32> to vector<16x32xf32>
    %16 = vector.extract_strided_slice %2 {offsets = [19, 32], sizes = [16, 32], strides = [1, 1]} : vector<36x96xf32> to vector<16x32xf32>
    %17 = arith.addf %15, %16 : vector<16x32xf32>
    %18 = vector.extract_strided_slice %2 {offsets = [20, 64], sizes = [16, 32], strides = [1, 1]} : vector<36x96xf32> to vector<16x32xf32>
    %19 = arith.addf %17, %18 : vector<16x32xf32>
    %cst_9 = arith.constant dense<0xFF800000> : vector<32xf32>
    %20 = vector.multi_reduction <maximumf>, %19, %cst_9 [0] : vector<16x32xf32> to vector<32xf32>
    %21 = vector.shape_cast %20 : vector<32xf32> to vector<1x32xf32>
    %22 = arith.addf %21, %3 : vector<1x32xf32>
    %cst_10 = arith.constant 0.000000e+00 : f32
    %23 = vector.broadcast %cst_10 : f32 to vector<1x32xf32>
    %24 = arith.maximumf %22, %23 : vector<1x32xf32>
    %c1 = arith.constant 1 : index
    %c0_11 = arith.constant 0 : index
    %25 = vector.load %arg4[%c1, %c0_11] : memref<2x32xf32, #tpu.memory_space<vmem>>, vector<1x32xf32>
    tpu.vector_store %arg4[%c1, %c0_11], %24 {strides = array<i32>} : memref<2x32xf32, #tpu.memory_space<vmem>>, vector<1x32xf32>,
    return
  }
  func.func @transform_0(%arg0: i32) -> (i32, i32) {
    %c0_i32 = arith.constant 0 : i32
    %c0_i32_0 = arith.constant 0 : i32
    return %arg0, %c0_i32 : i32, i32
  }
  func.func @transform_1(%arg0: i32) -> (i32, i32) {
    %c0_i32 = arith.constant 0 : i32
    %c0_i32_0 = arith.constant 0 : i32
    %c0_i32_1 = arith.constant 0 : i32
    return %c0_i32, %c0_i32_0 : i32, i32
  }
  func.func @transform_2(%arg0: i32) -> (i32, i32) {
    %c0_i32 = arith.constant 0 : i32
    %c0_i32_0 = arith.constant 0 : i32
    %c0_i32_1 = arith.constant 0 : i32
    return %c0_i32, %c0_i32_0 : i32, i32
  }
  func.func @transform_3(%arg0: i32) -> (i32, i32) {
    %c0_i32 = arith.constant 0 : i32
    %c0_i32_0 = arith.constant 0 : i32
    return %arg0, %c0_i32 : i32, i32
  }
}

</mosaic_0001>

<bundles_post_ra>
// kernel: tpu_custom_call.1
= control target key start
LH: loop header
LB: loop body
LE: loop exit
PB: predicated region body
PF: predicated region fallthrough
CT: control target
= control target key end

     0   :  { %v316_v3 = vmov 0.0|0.0   ;;  %vm317_vm0 = vmmov 0   ;;  %v318_v6 = vmov 0.0   ;;  %s405_s0 = inlined_call_operand.vmem [shape: f32[36,32], index: 0, kind: input, shape index: {}]   ;;  %s406_s1 = inlined_call_operand.vmem [shape: f32[32,96], index: 1, kind: input, shape index: {}]   ;;  %s407_s2 = inlined_call_operand.vmem [shape: f32[1,32], index: 2, kind: input, shape index: {}]   ;;  %s408_s3 = inlined_call_operand.hbm [shape: f32[2,32], index: 3, kind: output, shape index: {}]  }
   0x1   :  { %v20_v0 = vld [vmem:[%s406_s1] sm:$0xff]  ;;  %v21_v1 = vld [vmem:[%s406_s1 + $0x8] sm:$0xff]  ;;  %v22_v2 = vld [vmem:[%s406_s1 + $0x10] sm:$0xff]  ;;  %276 = vmatprep.subr.bf16.mxu0 %v316_v3  ;;  %282 = vmatprep.subr.bf16.mxu1 %v316_v3 }
   0x2   :  { %v277_v4 = vpack.c.bf16 %v21_v1, %v20_v0  ;;  %v23_v5 = vld [vmem:[%s406_s1 + $0x18] sm:$0xff]  ;;  %261 = vmatprep.mubr.msk.f32.mxu0 %vm317_vm0, %v318_v6  ;;  %270 = vmatprep.mubr.msk.f32.mxu1 %vm317_vm0, %v318_v6 }
   0x3   :  { %v280_v7 = vpack.c.bf16 %v23_v5, %v22_v2 }
   0x4   :  { %278 = vmatpush3.bf16.msra.mxu0 %v277_v4  ;;  %284 = vmatpush3.bf16.msra.mxu1 %v277_v4 }
   0x5   :  { %8 = vsyncpa [#allocation3], 0  ;;  %279 = vmatprep.subr.bf16.mxu0 %v316_v3  ;;  %283 = vmatprep.subr.bf16.mxu1 %v316_v3  ;;  %v15_v8 = vld [vmem:[%s405_s0] sm:$0xff]  ;;  %vm24_vm1 = vcmask 261120   ;;  %v18_v9 = vld [vmem:[%s405_s0 + $0x18] sm:$0xff]  ;;  %vm134_vm2 = vcmask 1046528  }
   0x6   :  { %v16_v10 = vld [vmem:[%s405_s0 + $0x8] sm:$0xff]  ;;  %v19_v11 = vld [vmem:[%s405_s0 + $0x20] sm:$0xf]  ;;  %v17_v12 = vld [vmem:[%s405_s0 + $0x10] sm:$0xff]  ;;  %vm148_vm3 = vcmask 1045504   ;;  %s319_s0 = smov 96  }
   0x7   :  { %s320_s29 = smov 64   ;;  %vm209_vm4 = vcmask 261122   ;;  %vm212_vm5 = vcmask 254976   ;;  %s321_s5 = smov [#allocation2]   ;;  %vm173_vm6 = vcmask 253952  }
   0x8   :  { %281 = vmatpush3.bf16.msra.mxu0 %v280_v7  ;;  %285 = vmatpush3.bf16.msra.mxu1 %v280_v7  ;;  %s231_s6 = sshll.u32 %s321_s5, 4  ;;  %s232_s6 = int_to_ptr.vmem [resolvable:$true] %s231_s6 }
   0x9   :  { %s292_s7 = scalar_lea.vmem %s232_s6, 32  ;;  %p297_p1 = scmp.lt.s32.totalorder %s232_s6, %s232_s6 }
   0xa   :  { %p293_p0 = scmp.ne.s32.totalorder %s232_s6, %s292_s7  ;;  %p298_p2 = scmp.lt.s32.totalorder %s292_s7, %s292_s7 }
   0xb   :  { %262 = vmatmul.mubr.msk.f32.vlgmr.msra.gmra.mrb[0].mxu0 %vm24_vm1, %v15_v8  ;;  %271 = vmatmul.mubr.msk.f32.vlgmr.msra.gmra.mrb[0].mxu1 %vm24_vm1, %v18_v9 }
   0xc   :  { %264 = vmatprep.mubr.msk.f32.mxu0 %vm317_vm0, %v318_v6  ;;  %273 = vmatprep.mubr.msk.f32.mxu1 %vm317_vm0, %v318_v6  ;;  %p299_p3 = por %p298_p2, %p297_p1 }
   0xe   :  { %p300_p4 = pnand %p299_p3, %p293_p0 }
   0xf   :  { %265 = vmatmul.mubr.msk.f32.gmra.mrb[2].mxu0 %vm24_vm1, %v16_v10  ;;  %274 = vmatmul.mubr.msk.f32.gmra.mrb[2].mxu1 %vm24_vm1, %v19_v11 }
  0x10   :  { %267 = vmatprep.mubr.msk.f32.mxu0 %vm317_vm0, %v318_v6 }
  0x13   :  { %268 = vmatmul.mubr.msk.f32.gmra.mrb[4].mxu0 %vm24_vm1, %v17_v12 }
  0xde   :  { %v106_v13 = vpop.f32.mrb[0].mxu0  ;;  %v121_v14 = vpop.f32.mrb[0].mxu1 }
  0xdf   :  { %v263_v15 = vpop.f32.mrb[1].mxu0  ;;  %v272_v16 = vpop.f32.mrb[1].mxu1  ;;  %v135_v17 = vrot.slane %v106_v13, 1  ;;  %v149_v18 = vrot.slane %v106_v13, 2  ;;  %v177_v19 = vrot.slane %v121_v14, 1  ;;  %v193_v20 = vrot.slane %v121_v14, 2 }
  0xe0   :  { %v130_v15 = vld [vmem:[%s407_s2] sm:$0x1] }
  0xe2   :  { %v111_v21 = vpop.f32.mrb[2].mxu0  ;;  %v126_v22 = vpop.f32.mrb[2].mxu1 }
  0xe3   :  { %v136_v23 = vrot.slane %v111_v21, 1  ;;  %v150_v24 = vrot.slane %v111_v21, 2  ;;  %v195_v25 = vrot.slane %v126_v22, 2  ;;  %v266_v26 = vpop.f32.mrb[3].mxu0  ;;  %v275_v27 = vpop.f32.mrb[3].mxu1  ;;  %v179_v28 = vrot.slane %v126_v22, 1 }
  0xe5   :  { %185 = vrot.lane.b32.xlu0 %v179_v28, %s319_s0  ;;  %v137_v29 = vsel %vm134_vm2, %v135_v17, %v136_v23  ;;  %v180_v30 = vsel %vm134_vm2, %v177_v19, %v179_v28  ;;  %v151_v31 = vsel %vm148_vm3, %v149_v18, %v150_v24  ;;  %v196_v32 = vsel %vm148_vm3, %v193_v20, %v195_v25 }
  0xe6   :  { %140 = vrot.lane.b32.xlu1 %v137_v29, %s319_s0  ;;  %v116_v33 = vpop.f32.mrb[4].mxu0 }
  0xe7   :  { %v138_v34 = vrot.slane %v116_v33, 1  ;;  %v152_v35 = vrot.slane %v116_v33, 2  ;;  %v269_v36 = vpop.f32.mrb[5].mxu0 }
  0xe9   :  { %183 = vrot.lane.b32.xlu0 %v180_v30, %s319_s0  ;;  %v139_v37 = vsel %vm134_vm2, %v136_v23, %v138_v34  ;;  %v178_v38 = vsel %vm134_vm2, %v138_v34, %v177_v19  ;;  %v194_v39 = vsel %vm148_vm3, %v152_v35, %v193_v20  ;;  %v153_v40 = vsel %vm148_vm3, %v150_v24, %v152_v35 }
  0xea   :  { %154 = vrot.lane.b32.xlu1 %v151_v31, %s320_s29 }
  0xed   :  { %199 = vrot.lane.b32.xlu0 %v196_v32, %s320_s29 }
  0xee   :  { %142 = vrot.lane.b32.xlu1 %v139_v37, %s319_s0 }
  0xf1   :  { %181 = vrot.lane.b32.xlu0 %v178_v38, %s319_s0 }
  0xf2   :  { %197 = vrot.lane.b32.xlu1 %v194_v39, %s320_s29 }
  0xf5   :  { %156 = vrot.lane.b32.xlu0 %v153_v40, %s320_s29 }
  0xf6   :  { %201 = vrot.lane.b32.xlu1 %v195_v25, %s320_s29 }
 0x157   :  { %v186_v41 = vpop.permute.xlu0 %185 }
 0x158   :  { %v141_v42 = vpop.permute.xlu1 %140  ;;  %v192_v56 = vadd.f32 %v186_v41, %v126_v22 }
 0x159   :  { %v146_v49 = vadd.f32 %v141_v42, %v106_v13 }
 0x15b   :  { %v184_v43 = vpop.permute.xlu0 %183 }
 0x15c   :  { %v155_v44 = vpop.permute.xlu1 %154  ;;  %v191_v47 = vadd.f32 %v184_v43, %v121_v14 }
 0x15d   :  { %v160_v53 = vadd.f32 %v155_v44, %v146_v49 }
 0x15f   :  { %v200_v45 = vpop.permute.xlu0 %199  ;;  %v162_v0 = vsel %vm24_vm1, %v160_v53, -inf }
 0x160   :  { %v143_v46 = vpop.permute.xlu1 %142  ;;  %v207_v50 = vadd.f32 %v200_v45, %v191_v47 }
 0x161   :  { %v147_v54 = vadd.f32 %v143_v46, %v111_v21 }
 0x162   :  { %v211_v58 = vsel %vm24_vm1, %v207_v50, -inf }
 0x163   :  { %v182_v48 = vpop.permute.xlu0 %181 }
 0x164   :  { %v190_v51 = vadd.f32 %v182_v48, %v116_v33  ;;  %v198_v52 = vpop.permute.xlu1 %197 }
 0x166   :  { %v206_v55 = vadd.f32 %v198_v52, %v190_v51 }
 0x167   :  { %v157_v57 = vpop.permute.xlu0 %156 }
 0x168   :  { %v210_v59 = vsel %vm209_vm4, %v206_v55, -inf  ;;  %v161_v60 = vadd.f32 %v157_v57, %v147_v54  ;;  %v202_v61 = vpop.permute.xlu1 %201 }
 0x169   :  { %v214_v62 = vmax.f32 %v210_v59, %v211_v58  ;;  %v208_v63 = vadd.f32 %v202_v61, %v192_v56 }
 0x16a   :  { %v163_v1 = vsel %vm24_vm1, %v161_v60, -inf }
 0x16b   :  { %v164_v2 = vmax.f32 %v162_v0, %v163_v1  ;;  %v213_v3 = vsel %vm212_vm5, %v208_v63, -inf }
 0x16c   :  { %v215_v4 = vmax.f32 %v214_v62, %v213_v3 }
 0x16d   :  { %v165_v5 = vrot.slane %v164_v2, 4 }
 0x16e   :  { %v216_v6 = vrot.slane %v215_v4, 4 }
 0x16f   :  { %v166_v7 = vmax.f32 %v164_v2, %v165_v5 }
 0x170   :  { %v217_v8 = vmax.f32 %v215_v4, %v216_v6 }
 0x171   :  { %v167_v9 = vrot.slane %v166_v7, 2 }
 0x172   :  { %v218_v10 = vrot.slane %v217_v8, 2 }
 0x173   :  { %v168_v11 = vmax.f32 %v166_v7, %v167_v9 }
 0x174   :  { %v219_v12 = vmax.f32 %v217_v8, %v218_v10 }
 0x175   :  { %v169_v13 = vrot.slane %v168_v11, 1 }
 0x176   :  { %v220_v14 = vrot.slane %v219_v12, 1 }
 0x177   :  { %v170_v16 = vmax.f32 %v168_v11, %v169_v13 }
 0x178   :  { %v221_v17 = vmax.f32 %v219_v12, %v220_v14 }
 0x179   :  { %v171_v18 = vadd.f32 %v170_v16, %v130_v15 }
 0x17a   :  { %v222_v19 = vadd.f32 %v221_v17, %v130_v15 }
 0x17b   :  { %v172_v20 = vmax.f32 %v171_v18, 0.0 }
 0x17c   :  { %v223_v21 = vmax.f32 %v222_v19, 0.0 }
 0x17d   :  { %174 = vst.msk [vmem:[#allocation2] sm:$0x1] %vm173_vm6, %v172_v20 }
 0x17e   :  { %224 = vst.msk [vmem:[#allocation2 + $0x1] sm:$0x1] %vm173_vm6, %v223_v21 }
 0x17f   :  { %303 = shalt.err (!%p300_p4)
}
 0x180   :  { %s304_s9 = scalar_lea.hbm %s408_s3, 32 }
 0x181   :  { %p305_p5 = scmp.ne.s32.totalorder %s408_s3, %s304_s9  ;;  %p308_p6 = scmp.lt.u32.totalorder %s304_s9, %s408_s3 }
 0x183   :  { %p310_p7 = pnand %p308_p6, %p305_p5 }
 0x185   :  { %313 = shalt.err (!%p310_p7)
}
 0x186   :  { %234 = dma.vmem_to_hbm [thread:$0]  %s232_s6, 32, %s408_s3, [#allocation3]  }
 0x187   :  { %314 = dma.done.wait [#allocation3], 32  }
 0x188   :  { %315 = vsyncadd [#allocation3], 4294967264 }
 0x189   :  { %238 = vsyncpa [#allocation3], 1 }

</bundles_post_ra>
